<compile_context>
chip_gen: v7x
topology: tpu7x:2x2x1
jax: 0.10.0
libtpu: 0.0.40
codegen_flags: <defaults>
</compile_context>

<pallas_src>
import functools
import math

import jax
import jax.numpy as jnp
from jax.experimental import pallas as pl
from jax.experimental.pallas import tpu as pltpu

NORM = 1.0
MU = 50.0


def _build_quant_params(nbit: int):
    """Deterministically reproduce Quantization.__init__ (pure Python floats)."""
    basis = [NORM / (2 ** nbit - 1) * (2.0 ** i) for i in range(nbit)]
    num_levels = 2 ** nbit
    levels = []
    for i in range(num_levels):
        code = []
        n = i
        for _ in range(nbit):
            code.append(float(n % 2))
            n //= 2
        levels.append(sum(c * b for c, b in zip(code, basis)))
    # LSB-first binary code x power-of-two basis => levels[i] == i*step (already
    # sorted), so thrs built from the unsorted list are the true midpoints.
    levels_sorted = sorted(levels)
    thrs = [0.5 * (levels[i - 1] + levels[i]) for i in range(1, num_levels)]
    return num_levels, thrs, levels_sorted


def _make_kernel(nbit: int):
    num_levels, thrs, levels = _build_quant_params(nbit)
    log1p_mu = math.log(1.0 + MU)
    inv_log1p_mu = 1.0 / log1p_mu
    inv_mu = 1.0 / MU
    step = NORM / (2 ** nbit - 1)
    inv_step = 1.0 / step

    # Fold compress -> quantize -> expand:  compress is monotone in |2x-1|, so
    # "x_c > thrs[i]" is equivalent to "|2x-1| > expand(thrs[i])".  Precompute
    # the |2x-1|-domain thresholds and the expanded output levels at trace time
    # so the kernel needs no log/exp per element (for the small-nbit chain).
    thr_abs = [(math.exp(t * log1p_mu) - 1.0) * inv_mu for t in thrs]
    out_levels = [(math.exp(l * log1p_mu) - 1.0) * inv_mu for l in levels]
    use_select_chain = num_levels <= 16  # nbit <= 4: 2^nbit-1 selects is cheap

    def kernel(x_ref, y_ref, stats_ref):
        x = x_ref[...].astype(jnp.float32)            # (TB, N)

        xc = 2.0 * x - 1.0
        x_sign = jnp.where(xc > 0.0, 1.0, -1.0).astype(jnp.float32)
        a = jnp.abs(xc)

        if use_select_chain:
            # Compare |2x-1| against pre-compressed thresholds, select the
            # pre-expanded output level (no transcendentals).
            q = jnp.zeros_like(a)                     # expanded level 0 == 0
            for i in range(num_levels - 1):
                q = jnp.where(a > jnp.float32(thr_abs[i]),
                              jnp.float32(out_levels[i + 1]), q)
        else:
            # Closed-form uniform quantizer in the compressed domain (O(1) ops
            # per element instead of an O(2^nbit) where-chain).
            x_c = jnp.log(1.0 + MU * a) * inv_log1p_mu
            idx = jnp.clip(jnp.floor(x_c * inv_step + 0.5),
                           0.0, float(num_levels - 1))
            q = (jnp.exp(idx * (step * log1p_mu)) - 1.0) * inv_mu

        # ---- decompress (mu-law expand; q is already the expanded magnitude) ----
        y_d = (q * x_sign + 1.0) * 0.5
        y_ref[...] = y_d.astype(y_ref.dtype)

        # ---- per-row SNR partials (finalized outside the kernel) ----
        err = x - y_d
        num = jnp.sum(x * x, axis=1, keepdims=True)       # (TB, 1)
        den = jnp.sum(err * err, axis=1, keepdims=True)   # (TB, 1)
        stats_ref[...] = jnp.concatenate([num, den], axis=1)

    return kernel


@functools.partial(jax.jit, static_argnames=("nbit",))
def quantization_forward(x: jax.Array, nbit: int = 2):
    """Returns (y, SNR) matching Quantization(nbit).forward(x); x is [B, N]."""
    assert x.ndim == 2, "layout: x must be [B, N]"
    B, N = x.shape

    # --- tile selection: ~8 MiB of input per step (double-buffered in + out is
    #     ~32 MiB for f32 -> fits v7x's 64 MiB physical VMEM with the explicit
    #     48 MiB limit below; v5e/v6e have 128 MiB so no constraint there).
    in_bytes_per_row = N * jnp.dtype(x.dtype).itemsize
    target_tile_bytes = 8 * 1024 * 1024
    rows_for_target = max(1, target_tile_bytes // max(1, in_bytes_per_row))
    tb = max(32, (rows_for_target // 32) * 32)   # multiple of 32: sublane packing
    if B <= 8:
        tb = B                                   # full batch dim (allowed)
    elif B <= tb:
        # Cap so the grid has >=2 steps: "parallel" then shards across both
        # v7x TensorCores even for small batches.
        tb = max(8, pl.cdiv(pl.cdiv(B, 2), 8) * 8)
    grid_b = pl.cdiv(B, tb)
    # TODO(synk): if N alone is so wide that even 8 rows overflow VMEM, also
    # tile N (last grid axis, "arbitrary") and accumulate row norms across
    # N-tiles with pl.when init/finalize.

    kernel = _make_kernel(nbit)

    y, stats = pl.pallas_call(
        kernel,
        out_shape=(
            jax.ShapeDtypeStruct((B, N), x.dtype),        # y in input dtype
            jax.ShapeDtypeStruct((B, 2), jnp.float32),    # [sum x^2, sum err^2]
        ),
        grid=(grid_b,),
        in_specs=[pl.BlockSpec((tb, N), lambda i: (i, 0))],
        out_specs=(
            pl.BlockSpec((tb, N), lambda i: (i, 0)),
            pl.BlockSpec((tb, 2), lambda i: (i, 0)),
        ),
        compiler_params=pltpu.CompilerParams(
            dimension_semantics=("parallel",),
            vmem_limit_bytes=48 * 1024 * 1024,
        ),
    )(x)

    num_sq = stats[:, 0]
    den_sq = stats[:, 1]
    # mean_b( ||x_b|| / ||x_b - y_b|| ) == mean_b( sqrt(sum x^2 / sum err^2) )
    snr = jnp.mean(jnp.sqrt(num_sq / den_sq))
    return y, snr


def _reference(x, nbit=2):
    """Pure-JAX reference mirroring the PyTorch forward (for correctness check)."""
    num_levels, thrs, levels = _build_quant_params(nbit)
    log1p_mu = math.log(1.0 + MU)
    xr = x
    xc = 2.0 * x - 1.0
    x_sign = jnp.where(xc > 0.0, 1.0, -1.0)
    x_c = jnp.log(1.0 + MU * jnp.abs(xc)) / log1p_mu
    y = jnp.zeros_like(x_c)
    for i in range(num_levels - 1):
        y = jnp.where(x_c > thrs[i], levels[i + 1], y)
    y_d = (jnp.exp(y * log1p_mu) - 1.0) / MU
    y_d = (y_d * x_sign + 1.0) * 0.5
    snr = jnp.mean(jnp.linalg.norm(xr, axis=1) / jnp.linalg.norm(xr - y_d, axis=1))
    return y_d, snr


if __name__ == "__main__":
    key = jax.random.PRNGKey(0)
    # small [batch, features] codeword layout; B=20 deliberately exercises the
    # multi-step grid with a ragged (masked) last block -> no pad/slice passes.
    B, N = 20, 128
    # codewords are typically in [0, 1] (sigmoid output) before compression
    x = jax.random.uniform(key, (B, N), dtype=jnp.float32)

    y, snr = quantization_forward(x, nbit=2)
    jax.block_until_ready((y, snr))

    y_ref, snr_ref = _reference(x, nbit=2)
    assert y.shape == (B, N) and y.dtype == x.dtype
    assert jnp.allclose(y, y_ref, atol=1e-5), "y mismatch"
    assert jnp.allclose(snr, snr_ref, atol=1e-4), "SNR mismatch"

    print("KERNEL_OK")
</pallas_src>

<mosaic_0001>
module attributes {stable_mosaic.version = 11 : i64} {
  func.func @kernel(%arg0: i32, %arg1: memref<16x128xf32, #tpu.memory_space<vmem>>, %arg2: memref<16x128xf32, #tpu.memory_space<vmem>>, %arg3: memref<16x2xf32, #tpu.memory_space<vmem>>) attributes {dimension_semantics = [#tpu.dimension_semantics<parallel>], iteration_bounds = array<i64: 2>, scalar_prefetch = 0 : i64, scratch_operands = 0 : i64, tpu.core_type = #tpu.core_type<tc>, window_params = [{transform_indices = @transform_0, window_bounds = array<i64: 16, 128>}, {transform_indices = @transform_1, window_bounds = array<i64: 16, 128>}, {transform_indices = @transform_2, window_bounds = array<i64: 16, 2>}]} {
    %c0 = arith.constant 0 : index
    %c0_0 = arith.constant 0 : index
    %0 = vector.load %arg1[%c0, %c0_0] : memref<16x128xf32, #tpu.memory_space<vmem>>, vector<16x128xf32>
    %cst = arith.constant 2.000000e+00 : f32
    %1 = vector.broadcast %cst : f32 to vector<16x128xf32>
    %2 = arith.mulf %1, %0 : vector<16x128xf32>
    %cst_1 = arith.constant 1.000000e+00 : f32
    %3 = vector.broadcast %cst_1 : f32 to vector<16x128xf32>
    %4 = arith.subf %2, %3 : vector<16x128xf32>
    %cst_2 = arith.constant 0.000000e+00 : f32
    %5 = vector.broadcast %cst_2 : f32 to vector<16x128xf32>
    %6 = arith.cmpf ogt, %4, %5 : vector<16x128xf32>
    %cst_3 = arith.constant 1.000000e+00 : f32
    %cst_4 = arith.constant -1.000000e+00 : f32
    %7 = vector.broadcast %cst_3 : f32 to vector<16x128xf32>
    %8 = vector.broadcast %cst_4 : f32 to vector<16x128xf32>
    %9 = arith.select %6, %7, %8 : vector<16x128xi1>, vector<16x128xf32>
    %10 = math.absf %4 : vector<16x128xf32>
    %cst_5 = arith.constant 0.000000e+00 : f32
    %11 = vector.broadcast %cst_5 : f32 to vector<16x128xf32>
    %cst_6 = arith.constant 0.018514568 : f32
    %12 = vector.broadcast %cst_6 : f32 to vector<16x128xf32>
    %13 = arith.cmpf ogt, %10, %12 : vector<16x128xf32>
    %cst_7 = arith.constant 0.0541685969 : f32
    %14 = vector.broadcast %cst_7 : f32 to vector<16x128xf32>
    %15 = arith.select %13, %14, %11 : vector<16x128xi1>, vector<16x128xf32>
    %cst_8 = arith.constant 0.122828566 : f32
    %16 = vector.broadcast %cst_8 : f32 to vector<16x128xf32>
    %17 = arith.cmpf ogt, %10, %16 : vector<16x128xf32>
    %cst_9 = arith.constant 0.25504902 : f32
    %18 = vector.broadcast %cst_9 : f32 to vector<16x128xf32>
    %19 = arith.select %17, %18, %15 : vector<16x128xi1>, vector<16x128xf32>
    %cst_10 = arith.constant 0.509669721 : f32
    %20 = vector.broadcast %cst_10 : f32 to vector<16x128xf32>
    %21 = arith.cmpf ogt, %10, %20 : vector<16x128xf32>
    %cst_11 = arith.constant 1.000000e+00 : f32
    %22 = vector.broadcast %cst_11 : f32 to vector<16x128xf32>
    %23 = arith.select %21, %22, %19 : vector<16x128xi1>, vector<16x128xf32>
    %24 = arith.mulf %23, %9 : vector<16x128xf32>
    %cst_12 = arith.constant 1.000000e+00 : f32
    %25 = vector.broadcast %cst_12 : f32 to vector<16x128xf32>
    %26 = arith.addf %24, %25 : vector<16x128xf32>
    %cst_13 = arith.constant 5.000000e-01 : f32
    %27 = vector.broadcast %cst_13 : f32 to vector<16x128xf32>
    %28 = arith.mulf %26, %27 : vector<16x128xf32>
    %c0_14 = arith.constant 0 : index
    %c0_15 = arith.constant 0 : index
    %29 = vector.load %arg2[%c0_14, %c0_15] : memref<16x128xf32, #tpu.memory_space<vmem>>, vector<16x128xf32>
    tpu.vector_store %arg2[%c0_14, %c0_15], %28 {strides = array<i32>} : memref<16x128xf32, #tpu.memory_space<vmem>>, vector<16x128xf32>,
    %30 = arith.subf %0, %28 : vector<16x128xf32>
    %31 = arith.mulf %0, %0 : vector<16x128xf32>
    %cst_16 = arith.constant dense<0.000000e+00> : vector<16xf32>
    %32 = vector.multi_reduction <add>, %31, %cst_16 [1] : vector<16x128xf32> to vector<16xf32>
    %33 = vector.shape_cast %32 : vector<16xf32> to vector<16x1xf32>
    %34 = arith.mulf %30, %30 : vector<16x128xf32>
    %cst_17 = arith.constant dense<0.000000e+00> : vector<16xf32>
    %35 = vector.multi_reduction <add>, %34, %cst_17 [1] : vector<16x128xf32> to vector<16xf32>
    %36 = vector.shape_cast %35 : vector<16xf32> to vector<16x1xf32>
    %37 = tpu.concatenate %33, %36 in 1 : vector<16x1xf32>, vector<16x1xf32> -> vector<16x2xf32>
    %c0_18 = arith.constant 0 : index
    %c0_19 = arith.constant 0 : index
    %38 = vector.load %arg3[%c0_18, %c0_19] : memref<16x2xf32, #tpu.memory_space<vmem>>, vector<16x2xf32>
    tpu.vector_store %arg3[%c0_18, %c0_19], %37 {strides = array<i32>} : memref<16x2xf32, #tpu.memory_space<vmem>>, vector<16x2xf32>,
    return
  }
  func.func @transform_0(%arg0: i32) -> (i32, i32) {
    %c0_i32 = arith.constant 0 : i32
    %c0_i32_0 = arith.constant 0 : i32
    return %arg0, %c0_i32 : i32, i32
  }
  func.func @transform_1(%arg0: i32) -> (i32, i32) {
    %c0_i32 = arith.constant 0 : i32
    %c0_i32_0 = arith.constant 0 : i32
    return %arg0, %c0_i32 : i32, i32
  }
  func.func @transform_2(%arg0: i32) -> (i32, i32) {
    %c0_i32 = arith.constant 0 : i32
    %c0_i32_0 = arith.constant 0 : i32
    return %arg0, %c0_i32 : i32, i32
  }
}

</mosaic_0001>

<bundles_post_ra>
// kernel: quantization_forward.1
= control target key start
LH: loop header
LB: loop body
LE: loop exit
PB: predicated region body
PF: predicated region fallthrough
CT: control target
= control target key end

     0   :  { %8 = vsyncpa [#allocation3], 0  ;;  %s1083_s0 = inlined_call_operand.hbm [shape: f32[20,128], index: 0, kind: input, shape index: {}]   ;;  %s1084_s1 = inlined_call_operand.hbm [shape: f32[20,128], index: 1, kind: output, shape index: {0}]   ;;  %s1085_s2 = inlined_call_operand.vmem [shape: f32[20,2], index: 2, kind: output, shape index: {1}]  }
   0x1   :  { %10 = vsyncpa [#allocation3 + $0x1], 0 }
   0x2   :  { %11 = vsyncpa [#allocation4], 0 }
   0x3   :  { %13 = vsyncpa [#allocation4 + $0x1], 0  ;;  %s868_s9 = smov 0   ;;  %s870_s10 = smov 0  }
   0x4   :  { %s872_s11 = smov 0   ;;  %s874_s12 = smov 0  }
   0x5 LB: > { %s889_s13 = sadd.s32 4294967295, %s811_s12   ;;  %s531_s14 = sadd.s32 4294967294, %s811_s12   ;;  %s811_s12 = sphi %s874_s12, %s1095_s12   ;;  %s807_s11 = sphi %s872_s11, %s1094_s11   ;;  %s803_s10 = sphi %s870_s10, %s1093_s10   ;;  %s799_s9 = sphi %s868_s9, %s1092_s9  }
   0x6   : > { %s893_s15 = sadd.s32 1, %s811_s12   ;;  %s26_s16 = sadd.s32 1, %s807_s11 }
   0x7   : > { %s23_s17 = ssub.s32 %s811_s12, %s893_s15  ;;  %p33_p0 = scmp.ne.s32.totalorder %s807_s11, %s803_s10 }
   0x8   : > { %p24_p1 = scmp.eq.s32.totalorder %s23_s17, 0  ;;  %p34_p2 = scmp.eq.s32.totalorder %s811_s12, 0 }
   0x9   : > { %p39_p3 = scmp.ne.s32.totalorder %s803_s10, %s799_s9  ;;  %p40_p4 = scmp.eq.s32.totalorder %s889_s13, 0 }
   0xa   : > { %s905_s18 = scalar_select %p24_p1, %s807_s11, %s26_s16  }
   0xb   : > { %p35_p5 = por %p34_p2, %p33_p0  ;;  %p907_p6 = por %p40_p4, %p39_p3 }
   0xc   : > { %p63_p7 = scmp.eq.s32.totalorder %s889_s13, 1  ;;  %p69_p8 = scmp.eq.s32.totalorder %s531_s14, 1 }
   0xd   : > { %p1086_p11 = scmp.ge.s32.totalorder %s811_s12, 2 }
   0xe   : > { %p912_p9 = por %p63_p7, %p33_p0  ;;  %p916_p10 = por %p69_p8, %p39_p3 }
   0xf   : > { %111 = sbr.rel (%p1086_p11) target bundleno = 57 (0x39), region = 16 }
  0x10   : > { %s1089_s21 = scalar_select %p916_p10, 1, 0 }
  0x16   : > { %114 = sbr.rel (!%p35_p5) target bundleno = 57 (0x39), region = 20  ;;  %s115_s22 = sand.u32 (%p35_p5), 1, %s807_s11  }
  0x17   : > { %s535_s23 = sshll.u32 (%p35_p5), %s811_s12, 1  ;;  %s534_s24 = sshll.u32 (%p35_p5), %s115_s22, 4 }
  0x18   : > { %s121_s25 = ssub.s32 (%p35_p5), 3, %s535_s23  ;;  %s928_s28 = scalar_lea.sflag (%p35_p5), [#allocation3], %s115_s22 }
  0x19   : > { %p122_p12 = scmp.lt.s32.totalorder (%p35_p5), %s121_s25, 2  ;;  %s119_s29 = scalar_lea.vmem (%p35_p5), [#allocation2], %s534_s24 }
  0x1d   : > { %s1097_s25 = smov (!%p122_p12, %s121_s25), 2 }
  0x1e   : > { %s925_s26 = sshll.u32 %s1097_s25, 7 }
  0x1f   : > { %s126_s27 = ssub.s32 256, %s925_s26 }
  0x20   : > { %127 = vsyncadd %s928_s28, %s126_s27  ;;  %p537_p13 = scmp.ne.s32.totalorder %s925_s26, 0  ;;  %s571_s30 = sshll.u32 %s811_s12, 8 }
  0x21   : > { %s936_s5 = scalar_lea.hbm %s1083_s0, %s571_s30  ;;  %s132_s6 = sshll.u32 %s119_s29, 4  ;;  %s938_s6 = int_to_ptr.vmem [resolvable:$true] %s132_s6 }
  0x22   : > { %s685_s7 = scalar_lea.hbm %s936_s5, %s925_s26  ;;  %s689_s16 = scalar_lea.hbm %s1083_s0, 384 }
  0x23   : > { %p686_p0 = scmp.ne.s32.totalorder %s936_s5, %s685_s7  ;;  %p690_p3 = scmp.lt.u32.totalorder %s936_s5, %s1083_s0 }
  0x24   : > { %p691_p4 = scmp.lt.u32.totalorder %s689_s16, %s685_s7  ;;  %p693_p7 = scmp.lt.u32.totalorder %s685_s7, %s936_s5 }
  0x25   : > { %p687_p1 = pnand %p686_p0, %p537_p13 }
  0x26   : > { %p692_p5 = por %p691_p4, %p690_p3 }
  0x27   : > { %p688_p2 = pneg %p687_p1 }
  0x28   : > { %p694_p8 = por %p693_p7, %p692_p5 }
  0x2a   : > { %p695_p12 = pnand %p694_p8, %p688_p2 }
  0x2c   : > { %698 = shalt.err (!%p695_p12)
}
  0x2d   : > { %s699_s23 = scalar_lea.vmem %s938_s6, %s925_s26  ;;  %s845_s24 = smov [#allocation2]  }
  0x2e   : > { %p700_p0 = scmp.ne.s32.totalorder %s938_s6, %s699_s23  ;;  %s703_s25 = sshll.u32 %s845_s24, 4  ;;  %s704_s25 = int_to_ptr.vmem [resolvable:$false] %s703_s25 }
  0x2f   : > { %s705_s27 = scalar_lea.vmem %s704_s25, 512  ;;  %p706_p10 = scmp.lt.s32.totalorder %s938_s6, %s704_s25 }
  0x30   : > { %p701_p1 = pnand %p700_p0, %p537_p13  ;;  %p707_p3 = scmp.lt.s32.totalorder %s705_s27, %s699_s23 }
  0x32   : > { %p702_p11 = pneg %p701_p1  ;;  %p708_p4 = por %p707_p3, %p706_p10 }
  0x34   : > { %p709_p5 = pnand %p708_p4, %p702_p11 }
  0x36   : > { %712 = shalt.err (!%p709_p5)
}
  0x37   : > { %s846_s29 = smov 128   ;;  %s847_s30 = smov 8  }
  0x38   : > { %138 = dma.hbm_to_vmem [thread:$0]  (%p537_p13), %s936_s5, %s925_s26, %s938_s6, %s928_s28, %s846_s29, %s846_s29, %s847_s30  }
  0x39 PF: > { %p541_p2 = scmp.ge.s32.totalorder %s811_s12, 1  ;;  %p140_p7 = scmp.lt.s32.totalorder %s811_s12, 3 }
  0x3b   : > { %p141_p8 = pnand %p541_p2, %p140_p7 }
  0x3c   : > { %s968_s3 = sand.u32 (!%p141_p8), 1, %s803_s10  }
  0x3d   : > { %144 = sbr.rel (%p141_p8) target bundleno = 322 (0x142), region = 24  ;;  %s971_s4 = sshll.u32 (!%p141_p8), %s968_s3, 4 }
  0x3e   : > { %s147_s7 = scalar_lea.sflag (!%p141_p8), [#allocation3], %s968_s3  ;;  %s150_s8 = scalar_lea.vmem (!%p141_p8), [#allocation2], %s971_s4 }
  0x44   : > { %790 = dma.done.wait (%p907_p6), %s147_s7, 256  }
  0x45   : > { %792 = vsyncadd (%p907_p6), %s147_s7, 4294967040  ;;  %v190_v0 = vld [vmem:[%s150_s8] sm:$0xff]  ;;  %v191_v1 = vld [vmem:[%s150_s8 + $0x8] sm:$0xff]  ;;  %v848_v10 = vmov -1.0   ;;  %v849_v13 = vmov 0.0   ;;  %s980_s19 = scalar_lea.vmem [#allocation5], %s971_s4 }
  0x46   : > { %v224_v2 = vmul.f32 %v190_v0, %v190_v0  ;;  %v192_v3 = vmul.f32 2.0, %v190_v0  ;;  %v193_v4 = vmul.f32 2.0, %v191_v1  ;;  %v225_v7 = vmul.f32 %v191_v1, %v191_v1  ;;  %s985_s26 = scalar_lea.vmem [#allocation6], %s971_s4   ;;  %s243_s28 = scalar_lea.sflag [#allocation4], %s968_s3 }
  0x47   : > { %vm236_vm8 = vcmask 7168   ;;  %vm239_vm9 = vcmask 15360   ;;  %s549_s5 = sshll.u32 (%p912_p9), %s889_s13, 1 }
  0x48   : > { %226 = vadd.xlane.f32.xlu0 %v224_v2  ;;  %v545_v5 = vadd.f32 -1.0, %v192_v3  ;;  %v546_v6 = vadd.f32 -1.0, %v193_v4  ;;  %s255_s6 = ssub.s32 (%p912_p9), 3, %s549_s5 }
  0x49   : > { %p256_p6 = scmp.lt.s32.totalorder (%p912_p9), %s255_s6, 2 }
  0x4a   : > { %v200_v8 = vand.u32 2147483647, %v545_v5  ;;  %vm196_vm0 = vcmp.gt.f32.partialorder %v545_v5, 0.0  ;;  %v201_v9 = vand.u32 2147483647, %v546_v6  ;;  %vm197_vm1 = vcmp.gt.f32.partialorder %v546_v6, 0.0 }
  0x4b   : > { %v198_v11 = vsel %vm196_vm0, 1.0, %v848_v10  ;;  %v199_v12 = vsel %vm197_vm1, 1.0, %v848_v10 }
  0x4c   : > { %vm202_vm2 = vcmp.gt.f32.partialorder %v200_v8, 0.018514568  ;;  %vm206_vm3 = vcmp.gt.f32.partialorder %v200_v8, 0.122828566  ;;  %vm210_vm4 = vcmp.gt.f32.partialorder %v200_v8, 0.5096697  ;;  %228 = vadd.xlane.f32.xlu0 %v225_v7 }
  0x4d   : > { %v204_v14 = vsel %vm202_vm2, 0.054168597, %v849_v13  ;;  %vm203_vm5 = vcmp.gt.f32.partialorder %v201_v9, 0.018514568  ;;  %vm207_vm6 = vcmp.gt.f32.partialorder %v201_v9, 0.122828566 }
  0x4e   : > { %v208_v15 = vsel %vm206_vm3, 0.25504902, %v204_v14  ;;  %v205_v16 = vsel %vm203_vm5, 0.054168597, %v849_v13  ;;  %vm211_vm7 = vcmp.gt.f32.partialorder %v201_v9, 0.5096697 }
  0x4f   : > { %v212_v17 = vsel %vm210_vm4, 1.0, %v208_v15  ;;  %v209_v18 = vsel %vm207_vm6, 0.25504902, %v205_v16 }
  0x50   : > { %v214_v19 = vmul.f32 %v212_v17, %v198_v11  ;;  %v213_v20 = vsel %vm211_vm7, 1.0, %v209_v18 }
  0x51   : > { %v215_v21 = vmul.f32 %v213_v20, %v199_v12 }
  0x52   : > { %v216_v22 = vadd.f32 1.0, %v214_v19 }
  0x53   : > { %v217_v23 = vadd.f32 1.0, %v215_v21 }
  0x54   : > { %v218_v24 = vmul.f32 0.5, %v216_v22 }
  0x55   : > { %v219_v25 = vmul.f32 0.5, %v217_v23 }
  0x56   : > { %v222_v26 = vsub.f32 %v190_v0, %v218_v24  ;;  %220 = vst [vmem:[%s980_s19] sm:$0xff] %v218_v24 }
  0x57   : > { %221 = vst [vmem:[%s980_s19 + $0x8] sm:$0xff] %v219_v25  ;;  %v223_v27 = vsub.f32 %v191_v1, %v219_v25 }
  0x58   : > { %v230_v28 = vmul.f32 %v222_v26, %v222_v26 }
  0x59   : > { %v231_v29 = vmul.f32 %v223_v27, %v223_v27 }
  0x5a   : > { %232 = vadd.xlane.f32.xlu1 %v230_v28 }
  0x5e   : > { %234 = vadd.xlane.f32.xlu1 %v231_v29 }
  0xd5   : > { %v227_v30 = vpop.xlane.xlu0 %226 }
  0xd9   : > { %v229_v33 = vpop.xlane.xlu0 %228 }
  0xe7   : > { %v233_v31 = vpop.xlane.xlu1 %232  ;;  %253 = sbr.rel (!%p912_p9) target bundleno = 266 (0x10a), region = 32 }
  0xe8   : > { %v237_v32 = vsel %vm236_vm8, %v227_v30, %v233_v31 }
  0xe9   : > { %240 = vst.msk [vmem:[%s985_s26] sm:$0xff] %vm239_vm9, %v237_v32 }
  0xeb   : > { %v235_v34 = vpop.xlane.xlu1 %234 }
  0xec   : > { %v238_v35 = vsel %vm236_vm8, %v229_v33, %v235_v34 }
  0xed   : > { %241 = vst.msk [vmem:[%s985_s26 + $0x8] sm:$0xff] %vm239_vm9, %v238_v35 }
  0xee   : > { %s1099_s6 = smov (!%p256_p6, %s255_s6), 2 }
  0xef   : > { %s993_s14 = sshll.u32 %s1099_s6, 7 }
  0xf0   : > { %s260_s16 = ssub.s32 256, %s993_s14 }
  0xf1   : > { %261 = vsyncadd %s243_s28, %s260_s16  ;;  %p551_p10 = scmp.ne.s32.totalorder %s993_s14, 0  ;;  %s572_s17 = sshll.u32 %s889_s13, 8 }
  0xf2   : > { %s1003_s24 = scalar_lea.hbm %s1084_s1, %s572_s17  ;;  %s266_s25 = sshll.u32 %s980_s19, 4  ;;  %s1006_s25 = int_to_ptr.vmem [resolvable:$true] %s266_s25 }
  0xf3   : > { %s713_s27 = scalar_lea.vmem %s1006_s25, %s993_s14  ;;  %s850_s29 = smov [#allocation5]  }
  0xf4   : > { %p714_p11 = scmp.ne.s32.totalorder %s1006_s25, %s713_s27  ;;  %s717_s30 = sshll.u32 %s850_s29, 4  ;;  %s718_s30 = int_to_ptr.vmem [resolvable:$false] %s717_s30 }
  0xf5   : > { %s719_s4 = scalar_lea.vmem %s718_s30, 512  ;;  %p720_p0 = scmp.lt.s32.totalorder %s1006_s25, %s718_s30 }
  0xf6   : > { %p715_p13 = pnand %p714_p11, %p551_p10  ;;  %p721_p1 = scmp.lt.s32.totalorder %s719_s4, %s713_s27 }
  0xf8   : > { %p716_p12 = pneg %p715_p13  ;;  %p722_p3 = por %p721_p1, %p720_p0 }
  0xfa   : > { %p723_p4 = pnand %p722_p3, %p716_p12 }
  0xfc   : > { %726 = shalt.err (!%p723_p4)
}
  0xfd   : > { %s727_s7 = scalar_lea.hbm %s1003_s24, %s993_s14  ;;  %s731_s5 = scalar_lea.hbm %s1084_s1, 384 }
  0xfe   : > { %p728_p5 = scmp.ne.s32.totalorder %s1003_s24, %s727_s7  ;;  %p732_p8 = scmp.lt.u32.totalorder %s1003_s24, %s1084_s1 }
  0xff   : > { %p733_p6 = scmp.lt.u32.totalorder %s731_s5, %s727_s7  ;;  %p735_p13 = scmp.lt.u32.totalorder %s727_s7, %s1003_s24 }
 0x100   : > { %p729_p2 = pnand %p728_p5, %p551_p10 }
 0x101   : > { %p734_p11 = por %p733_p6, %p732_p8 }
 0x102   : > { %p730_p7 = pneg %p729_p2 }
 0x103   : > { %p736_p12 = por %p735_p13, %p734_p11 }
 0x105   : > { %p737_p0 = pnand %p736_p12, %p730_p7 }
 0x107   : > { %740 = shalt.err (!%p737_p0)
}
 0x108   : > { %s851_s17 = smov 128   ;;  %s852_s22 = smov 8  }
 0x109   : > { %272 = dma.vmem_to_hbm [thread:$0]  (%p551_p10), %s1006_s25, %s993_s14, %s1003_s24, %s243_s28, %s851_s17, %s851_s17, %s852_s22  }
 0x10a PF: > { %275 = sbr.rel (!%p912_p9) target bundleno = 322 (0x142), region = 36  ;;  %s555_s23 = sshll.u32 (%p912_p9), %s889_s13, 1 }
 0x10b   : > { %s573_s27 = sshll.u32 (%p912_p9), %s889_s13, 4  ;;  %s277_s29 = ssub.s32 (%p912_p9), 3, %s555_s23 }
 0x10c   : > { %s1041_s7 = scalar_lea.vmem (%p912_p9), %s1085_s2, %s573_s27   ;;  %p278_p1 = scmp.lt.s32.totalorder (%p912_p9), %s277_s29, 2 }
 0x111   : > { %s1101_s29 = smov (!%p278_p1, %s277_s29), 2 }
 0x112   : > { %s556_s3 = sshll.u32 %s1101_s29, 7 }
 0x113   : > { %p559_p10 = scmp.eq.s32.totalorder %s556_s3, 0 }
 0x114   : > { %s1047_s20 = sshrl.u32 (!%p559_p10), %s1101_s29, 1 }
 0x115   : > { %286 = sbr.rel (%p559_p10) target bundleno = 322 (0x142), region = 40  ;;  %p560_p9 = scmp.le.s32.totalorder (!%p559_p10), %s1047_s20, 0 }
 0x11c   : > { %475 = sbr.rel (%p560_p9) target bundleno = 301 (0x12d), region = 135  ;;  %s813_s13 = smov (!%p560_p9), %s1041_s7  }
 0x11d   : > { %s817_s28 = smov (!%p560_p9), %s985_s26   ;;  %s821_s14 = smov (!%p560_p9), 0  }
 0x11e   : > { %s825_s24 = smov (!%p560_p9), 0  }
 0x123 LB: >> { %v350_v36 = vld [vmem:[%s819_s28] sm:$0xff]  ;;  %v352_v37 = vld [vmem:[%s819_s28 + $0x8] sm:$0xff]  ;;  %s354_s25 = sadd.s32 1, %s823_s14  ;;  %s344_s24 = sadd.s32 1, %s827_s24   ;;  %s827_s24 = sphi %s825_s24, %s344_s24   ;;  %s823_s14 = sphi %s821_s14, %s822_s14   ;;  %s819_s28 = sphi %s817_s28, %s359_s28   ;;  %s815_s13 = sphi %s813_s13, %s360_s13  }
 0x124   : >> { %351 = vst [vmem:[%s815_s13] sm:$0xff] %v350_v36  ;;  %353 = vst [vmem:[%s815_s13 + $0x8] sm:$0xff] %v352_v37  ;;  %p355_p3 = scmp.ge.s32.totalorder %s354_s25, %s1047_s20  ;;  %p343_p4 = scmp.ge.s32.totalorder %s344_s24, %s1047_s20 }
 0x126   : >> { %s1103_s25 = smov (%p355_p3, %s354_s25), 0  ;;  %346 = sbr.rel (!%p343_p4) target bundleno = 291 (0x123), region = 141 }
 0x127   : >> { %s561_s8 = sshll.u32 %s1103_s25, 4  ;;  %s822_s14 = smov %s1103_s25  }
 0x128   : >> { %s359_s28 = scalar_lea.vmem %s985_s26, %s561_s8 [#allocation6]   ;;  %s360_s13 = scalar_lea.vmem %s1041_s7, %s561_s8  }
 0x12d PF: > { %s1057_s19 = sand.u32 1, %s1101_s29   ;;  %s574_s5 = sshll.u32 %s1047_s20, 4 }
 0x12e   : > { %s365_s6 = scalar_lea.vmem %s985_s26, %s574_s5 [#allocation6]   ;;  %s367_s16 = scalar_lea.vmem %s1041_s7, %s574_s5  }
 0x12f   : > { %p566_p5 = scmp.le.s32.totalorder %s1057_s19, 0 }
 0x130   : > { %s829_s17 = smov (!%p566_p5), %s367_s16   ;;  %s833_s22 = smov (!%p566_p5), %s365_s6  }
 0x131   : > { %489 = sbr.rel (%p566_p5) target bundleno = 322 (0x142), region = 146  ;;  %s837_s23 = smov (!%p566_p5), 0  }
 0x132   : > { %s841_s27 = smov (!%p566_p5), 0  }
 0x138 LB: >> { %v377_v38 = vld [vmem:[%s835_s22] sm:$0xff]  ;;  %s379_s29 = sadd.s32 1, %s839_s23  ;;  %s371_s27 = sadd.s32 1, %s843_s27   ;;  %s843_s27 = sphi %s841_s27, %s371_s27   ;;  %s839_s23 = sphi %s837_s23, %s838_s23   ;;  %s835_s22 = sphi %s833_s22, %s384_s22   ;;  %s831_s17 = sphi %s829_s17, %s385_s17  }
 0x139   : >> { %378 = vst [vmem:[%s831_s17] sm:$0xff] %v377_v38  ;;  %p380_p2 = scmp.ge.s32.totalorder %s379_s29, %s1057_s19  ;;  %p370_p7 = scmp.ge.s32.totalorder %s371_s27, %s1057_s19 }
 0x13b   : >> { %s1105_s29 = smov (%p380_p2, %s379_s29), 0  ;;  %373 = sbr.rel (!%p370_p7) target bundleno = 312 (0x138), region = 152 }
 0x13c   : >> { %s567_s26 = sshll.u32 %s1105_s29, 3  ;;  %s838_s23 = smov %s1105_s29  }
 0x13d   : >> { %s384_s22 = scalar_lea.vmem %s365_s6, %s567_s26 [#allocation6]   ;;  %s385_s17 = scalar_lea.vmem %s367_s16, %s567_s26  }
 0x142 PF: > { %s397_s30 = sand.u32 1, %s799_s9   ;;  %p1090_p8 = scmp.ne.s32.totalorder %s1089_s21, 0 }
 0x143   : > { %p1091_p6 = scmp.ge.s32.totalorder %s811_s12, 2  ;;  %s398_s4 = scalar_lea.sflag [#allocation4], %s397_s30 }
 0x145   : > { %p579_p11 = pnand %p1091_p6, %p1090_p8 }
 0x147   : > { %794 = dma.done.wait (!%p579_p11), %s398_s4, 256  }
 0x148   : > { %796 = vsyncadd (!%p579_p11), %s398_s4, 4294967040  ;;  %p16_p13 = scmp.ge.s32.totalorder %s893_s15, 4   ;;  %s1092_s9 = smov %s803_s10 }
 0x149   : > { %s1093_s10 = smov %s807_s11  ;;  %s1094_s11 = smov %s905_s18 }
 0x14a   : > { %s1095_s12 = smov %s893_s15  ;;  %18 = sbr.rel (!%p16_p13) target bundleno = 5 (0x5), region = 163 }
 0x151   :  { %410 = vsyncpa [#allocation3], 1 }
 0x152   :  { %412 = vsyncpa [#allocation3 + $0x1], 1 }
 0x153   :  { %413 = vsyncpa [#allocation4], 1 }
 0x154   :  { %415 = vsyncpa [#allocation4 + $0x1], 1 }

</bundles_post_ra>
